<compile_context>
chip_gen: v7x
topology: tpu7x:2x2x1
jax: 0.10.0
libtpu: 0.0.40
codegen_flags: <defaults>
</compile_context>

<pallas_src>
import jax
import jax.numpy as jnp
from jax.experimental import pallas as pl
from jax.experimental.pallas import tpu as pltpu


def _make_reward_head_kernel(inv_tm1: float):
    """Builds the per-(batch-tile, seq-tile) kernel.

    Refs:
      h_ref  : [bB, tT, H]  hidden-state tile (bf16 or f32)
      w_ref  : [1, H]       value-head weight, lane-dense, f32
      b_ref  : [1, 1]       value-head bias, f32
      o_ref  : [bB, 1]      per-row reward output, f32
      acc_ref: [bB, H]      f32 running token-sum (VMEM scratch)
    """

    def kernel(h_ref, w_ref, b_ref, o_ref, acc_ref):
        t = pl.program_id(1)

        @pl.when(t == 0)
        def _init():
            acc_ref[...] = jnp.zeros_like(acc_ref)

        # Upcast the tile to f32 (v5e has no bf16 VALU; exact accumulation).
        h = h_ref[...].astype(jnp.float32)          # [bB, tT, H]
        # Streaming token-sum on the VPU/XLU (no MXU, no per-token mask).
        acc_ref[...] += jnp.sum(h, axis=1)          # [bB, H]

        @pl.when(t == pl.num_programs(1) - 1)
        def _finalize():
            # PyTorch drops the last token (values[:, :-1]); the mean is
            # linear, so subtract its hidden state from the running sum.
            s = acc_ref[...] - h[:, -1, :]          # [bB, H]
            # Value head as a lane-dense VPU multiply + lane reduce.
            vals = jnp.sum(s * w_ref[...], axis=-1, keepdims=True)   # [bB, 1]
            o_ref[...] = vals * inv_tm1 + b_ref[0, 0]

    return kernel


def _pick_seq_tile(T, b_tile, H, itemsize, budget_bytes=2 << 20):
    """Largest divisor of T that is 8-aligned (or == T) and fits the budget."""
    candidates = [d for d in range(1, T + 1)
                  if T % d == 0 and (d == T or d % 8 == 0)]
    fitting = [d for d in candidates if b_tile * d * H * itemsize <= budget_bytes]
    return max(fitting) if fitting else min(candidates)


def reward_head_pallas(hidden, w, b, *, b_tile=None, t_tile=None):
    """hidden: [B, T, H] (bf16/f32), w: [H, 1], b: [1, 1]  ->  value: [B] f32."""
    B, T, H = hidden.shape
    if T < 2:
        raise ValueError("RewardModel mean over values[:, :-1] requires T >= 2")

    w_row = jnp.asarray(w, jnp.float32).reshape(1, H)    # lane-dense weight
    b_arr = jnp.asarray(b, jnp.float32).reshape(1, 1)

    if b_tile is None:
        b_tile = B if B <= 8 else next(d for d in (8, 4, 2, 1) if B % d == 0)
    if t_tile is None:
        t_tile = _pick_seq_tile(T, b_tile, H, jnp.dtype(hidden.dtype).itemsize)
    assert B % b_tile == 0 and T % t_tile == 0
    assert t_tile == T or t_tile % 8 == 0

    inv_tm1 = 1.0 / float(T - 1)
    grid = (B // b_tile, T // t_tile)

    out = pl.pallas_call(
        _make_reward_head_kernel(inv_tm1),
        out_shape=jax.ShapeDtypeStruct((B, 1), jnp.float32),
        grid_spec=pltpu.PrefetchScalarGridSpec(
            num_scalar_prefetch=0,
            grid=grid,
            in_specs=[
                pl.BlockSpec((b_tile, t_tile, H), lambda i, t: (i, t, 0)),
                pl.BlockSpec((1, H), lambda i, t: (0, 0)),
                pl.BlockSpec((1, 1), lambda i, t: (0, 0)),
            ],
            out_specs=pl.BlockSpec((b_tile, 1), lambda i, t: (i, 0)),
            scratch_shapes=[pltpu.VMEM((b_tile, H), jnp.float32)],
        ),
        compiler_params=pltpu.CompilerParams(
            dimension_semantics=("parallel", "arbitrary")),
    )(hidden, w_row, b_arr)
    return out[:, 0]


def synthetic_backbone(sequences, emb_table, proj_w, proj_b, attention_mask=None):
    """Tiny deterministic stand-in for self.model(...)['last_hidden_state'].

    sequences: int32 [B, T] token ids -> last_hidden_state f32 [B, T, H].
    """
    # TODO(synk): attention_mask is accepted but unused by this synthetic backbone.
    emb = jnp.take(emb_table, sequences, axis=0)          # [B, T, H]
    return jnp.tanh(emb @ proj_w + proj_b)                # [B, T, H]


def reward_model_forward(sequences, params, attention_mask=None):
    hidden = synthetic_backbone(
        sequences, params["emb_table"], params["proj_w"], params["proj_b"],
        attention_mask=attention_mask)
    # Feed the bandwidth-bound head bf16 inputs; accumulation stays f32 inside.
    return reward_head_pallas(hidden.astype(jnp.bfloat16),
                              params["vh_w"], params["vh_b"])


def init_params(key, vocab, n_embd):
    k0, k1, k2, k3 = jax.random.split(key, 4)
    # Deterministic parameter init (nn.Linear-style uniform for the value head).
    bound = 1.0 / jnp.sqrt(jnp.float32(n_embd))
    return {
        "emb_table": jax.random.normal(k0, (vocab, n_embd), jnp.float32) * 0.02,
        "proj_w": jax.random.normal(k1, (n_embd, n_embd), jnp.float32) * 0.02,
        "proj_b": jnp.zeros((n_embd,), jnp.float32),
        "vh_w": jax.random.uniform(k2, (n_embd, 1), jnp.float32, -bound, bound),
        "vh_b": jax.random.uniform(k3, (1, 1), jnp.float32, -bound, bound),
    }


if __name__ == "__main__":
    key = jax.random.PRNGKey(0)
    B, T, H, VOCAB = 2, 8, 32, 64

    kp, ks = jax.random.split(key)
    params = init_params(kp, VOCAB, H)
    sequences = jax.random.randint(ks, (B, T), 0, VOCAB, dtype=jnp.int32)
    attention_mask = jnp.ones((B, T), jnp.int32)

    value = reward_model_forward(sequences, params, attention_mask=attention_mask)
    value = jax.block_until_ready(value)

    # Pure-JAX reference of the value-head + mean path over the same bf16
    # hidden states the kernel consumes (f32 math, VPU-style dot).
    hidden = synthetic_backbone(sequences, params["emb_table"],
                                params["proj_w"], params["proj_b"])
    h_q = hidden.astype(jnp.bfloat16).astype(jnp.float32)            # [B,T,H]
    ref_tok = jnp.sum(h_q * params["vh_w"][:, 0], axis=-1) + params["vh_b"][0, 0]
    ref = ref_tok[:, :-1].mean(axis=1)                               # [B]

    assert value.shape == (B,)
    assert jnp.allclose(value, ref, atol=1e-4, rtol=1e-4), (value, ref)

    print("KERNEL_OK")
</pallas_src>

<mosaic_0001>
module attributes {stable_mosaic.version = 11 : i64} {
  func.func @kernel(%arg0: i32, %arg1: i32, %arg2: memref<2x8x32xbf16, #tpu.memory_space<vmem>>, %arg3: memref<1x32xf32, #tpu.memory_space<vmem>>, %arg4: memref<1x1xf32, #tpu.memory_space<vmem>>, %arg5: memref<2x1xf32, #tpu.memory_space<vmem>>, %arg6: memref<2x32xf32, #tpu.memory_space<vmem>>) attributes {dimension_semantics = [#tpu.dimension_semantics<parallel>, #tpu.dimension_semantics<arbitrary>], iteration_bounds = array<i64: 1, 1>, scalar_prefetch = 0 : i64, scratch_operands = 1 : i64, tpu.core_type = #tpu.core_type<tc>, window_params = [{transform_indices = @transform_0, window_bounds = array<i64: 2, 8, 32>}, {pipeline_mode = #tpu.pipeline_mode<synchronous>, transform_indices = @transform_1, window_bounds = array<i64: 1, 32>}, {pipeline_mode = #tpu.pipeline_mode<synchronous>, transform_indices = @transform_2, window_bounds = array<i64: 1, 1>}, {transform_indices = @transform_3, window_bounds = array<i64: 2, 1>}]} {
    %c0_i32 = arith.constant 0 : i32
    %0 = arith.cmpi eq, %arg1, %c0_i32 : i32
    %1 = arith.extui %0 : i1 to i32
    %c0_i32_0 = arith.constant 0 : i32
    %2 = arith.cmpi ne, %1, %c0_i32_0 : i32
    scf.if %2 {
      %cst_9 = arith.constant 0.000000e+00 : f32
      %12 = vector.broadcast %cst_9 : f32 to vector<2x32xf32>
      %c0_10 = arith.constant 0 : index
      %c0_11 = arith.constant 0 : index
      %13 = vector.load %arg6[%c0_10, %c0_11] : memref<2x32xf32, #tpu.memory_space<vmem>>, vector<2x32xf32>
      tpu.vector_store %arg6[%c0_10, %c0_11], %12 {strides = array<i32>} : memref<2x32xf32, #tpu.memory_space<vmem>>, vector<2x32xf32>,
    } else {
    }
    %c0 = arith.constant 0 : index
    %c0_1 = arith.constant 0 : index
    %c0_2 = arith.constant 0 : index
    %3 = vector.load %arg2[%c0, %c0_1, %c0_2] : memref<2x8x32xbf16, #tpu.memory_space<vmem>>, vector<2x8x32xbf16>
    %4 = arith.extf %3 : vector<2x8x32xbf16> to vector<2x8x32xf32>
    %c0_3 = arith.constant 0 : index
    %c0_4 = arith.constant 0 : index
    %5 = vector.load %arg6[%c0_3, %c0_4] : memref<2x32xf32, #tpu.memory_space<vmem>>, vector<2x32xf32>
    %cst = arith.constant dense<0.000000e+00> : vector<2x32xf32>
    %6 = vector.multi_reduction <add>, %4, %cst [1] : vector<2x8x32xf32> to vector<2x32xf32>
    %7 = arith.addf %5, %6 : vector<2x32xf32>
    %c0_5 = arith.constant 0 : index
    %c0_6 = arith.constant 0 : index
    %8 = vector.load %arg6[%c0_5, %c0_6] : memref<2x32xf32, #tpu.memory_space<vmem>>, vector<2x32xf32>
    tpu.vector_store %arg6[%c0_5, %c0_6], %7 {strides = array<i32>} : memref<2x32xf32, #tpu.memory_space<vmem>>, vector<2x32xf32>,
    %c0_i32_7 = arith.constant 0 : i32
    %9 = arith.cmpi eq, %arg1, %c0_i32_7 : i32
    %10 = arith.extui %9 : i1 to i32
    %c0_i32_8 = arith.constant 0 : i32
    %11 = arith.cmpi ne, %10, %c0_i32_8 : i32
    scf.if %11 {
      %c0_9 = arith.constant 0 : index
      %c0_10 = arith.constant 0 : index
      %12 = vector.load %arg6[%c0_9, %c0_10] : memref<2x32xf32, #tpu.memory_space<vmem>>, vector<2x32xf32>
      %13 = vector.extract_strided_slice %4 {offsets = [0, 7, 0], sizes = [2, 1, 32], strides = [1, 1, 1]} : vector<2x8x32xf32> to vector<2x1x32xf32>
      %14 = vector.shape_cast %13 : vector<2x1x32xf32> to vector<2x32xf32>
      %15 = arith.subf %12, %14 : vector<2x32xf32>
      %c0_11 = arith.constant 0 : index
      %c0_12 = arith.constant 0 : index
      %16 = vector.load %arg3[%c0_11, %c0_12] : memref<1x32xf32, #tpu.memory_space<vmem>>, vector<1x32xf32>
      %17 = vector.broadcast %16 : vector<1x32xf32> to vector<2x32xf32>
      %18 = arith.mulf %15, %17 : vector<2x32xf32>
      %cst_13 = arith.constant dense<0.000000e+00> : vector<2xf32>
      %19 = vector.multi_reduction <add>, %18, %cst_13 [1] : vector<2x32xf32> to vector<2xf32>
      %20 = vector.shape_cast %19 : vector<2xf32> to vector<2x1xf32>
      %cst_14 = arith.constant 0.142857149 : f32
      %21 = vector.broadcast %cst_14 : f32 to vector<2x1xf32>
      %22 = arith.mulf %20, %21 : vector<2x1xf32>
      %c0_15 = arith.constant 0 : index
      %c0_16 = arith.constant 0 : index
      %23 = vector.load %arg4[%c0_15, %c0_16] : memref<1x1xf32, #tpu.memory_space<vmem>>, vector<1x1xf32>
      %24 = vector.extract %23[0, 0] : f32 from vector<1x1xf32>
      %25 = vector.broadcast %24 : f32 to vector<2x1xf32>
      %26 = arith.addf %22, %25 : vector<2x1xf32>
      %c0_17 = arith.constant 0 : index
      %c0_18 = arith.constant 0 : index
      %27 = vector.load %arg5[%c0_17, %c0_18] : memref<2x1xf32, #tpu.memory_space<vmem>>, vector<2x1xf32>
      tpu.vector_store %arg5[%c0_17, %c0_18], %26 {strides = array<i32>} : memref<2x1xf32, #tpu.memory_space<vmem>>, vector<2x1xf32>,
    } else {
    }
    return
  }
  func.func @transform_0(%arg0: i32, %arg1: i32) -> (i32, i32, i32) {
    %c0_i32 = arith.constant 0 : i32
    %c0_i32_0 = arith.constant 0 : i32
    return %arg0, %arg1, %c0_i32 : i32, i32, i32
  }
  func.func @transform_1(%arg0: i32, %arg1: i32) -> (i32, i32) {
    %c0_i32 = arith.constant 0 : i32
    %c0_i32_0 = arith.constant 0 : i32
    %c0_i32_1 = arith.constant 0 : i32
    return %c0_i32, %c0_i32_0 : i32, i32
  }
  func.func @transform_2(%arg0: i32, %arg1: i32) -> (i32, i32) {
    %c0_i32 = arith.constant 0 : i32
    %c0_i32_0 = arith.constant 0 : i32
    %c0_i32_1 = arith.constant 0 : i32
    return %c0_i32, %c0_i32_0 : i32, i32
  }
  func.func @transform_3(%arg0: i32, %arg1: i32) -> (i32, i32) {
    %c0_i32 = arith.constant 0 : i32
    %c0_i32_0 = arith.constant 0 : i32
    return %arg0, %c0_i32 : i32, i32
  }
}

</mosaic_0001>

<bundles_post_ra>
// kernel: tpu_custom_call.1
= control target key start
LH: loop header
LB: loop body
LE: loop exit
PB: predicated region body
PF: predicated region fallthrough
CT: control target
= control target key end

     0   :  { %s181_s0 = inlined_call_operand.hbm [shape: bf16[2,8,32], index: 0, kind: input, shape index: {}]   ;;  %s182_s1 = inlined_call_operand.vmem [shape: f32[1,32], index: 1, kind: input, shape index: {}]   ;;  %s183_s2 = inlined_call_operand.<no memory space> [shape: f32[1,1], index: 2, kind: input, shape index: {}]   ;;  %s184_s3 = inlined_call_operand.vmem [shape: f32[2,1], index: 3, kind: output, shape index: {}]  }
   0x1   :  { %v8_v0 = vstv %s183_s2 }
   0x2   :  { %9 = vst [vmem:[#allocation3] sm:$0x1] %v8_v0 }
   0x3   :  { %10 = vsyncpa [#allocation5], 0  ;;  %s133_s14 = smov [#allocation4]   ;;  %s109_s18 = scalar_lea.hbm %s181_s0, 128 }
   0x4   :  { %s16_s15 = sshll.u32 %s133_s14, 4  ;;  %p110_p0 = scmp.ne.s32.totalorder %s181_s0, %s109_s18  ;;  %s17_s15 = int_to_ptr.vmem [resolvable:$true] %s16_s15 }
   0x5   :  { %p113_p1 = scmp.lt.u32.totalorder %s109_s18, %s181_s0 }
   0x7   :  { %p115_p2 = pnand %p113_p1, %p110_p0 }
   0x9   :  { %118 = shalt.err (!%p115_p2)
}
   0xa   :  { %s119_s2 = scalar_lea.vmem %s17_s15, 128  ;;  %p124_p4 = scmp.lt.s32.totalorder %s17_s15, %s17_s15 }
   0xb   :  { %p120_p3 = scmp.ne.s32.totalorder %s17_s15, %s119_s2  ;;  %p125_p5 = scmp.lt.s32.totalorder %s119_s2, %s119_s2 }
   0xd   :  { %p126_p6 = por %p125_p5, %p124_p4 }
   0xf   :  { %p127_p7 = pnand %p126_p6, %p120_p3 }
  0x11   :  { %130 = shalt.err (!%p127_p7)
}
  0x12   :  { %s134_s23 = smov 64   ;;  %s135_s24 = smov 4  }
  0x13   :  { %22 = dma.hbm_to_vmem [thread:$0]  %s181_s0, 128, %s17_s15, [#allocation5], %s134_s23, %s134_s23, %s135_s24  }
  0x14   :  { %131 = dma.done.wait [#allocation5], 128  }
  0x15   :  { %132 = vsyncadd [#allocation5], 4294967168  ;;  %vm34_vm0 = vcmask 254976   ;;  %v136_v1 = vmov 0.0   ;;  %v100_v2 = vld [vmem:[#allocation4] sm:$0xff]   ;;  %vm41_vm1 = vcmask 261120  }
  0x16   :  { %35 = vst.msk [vmem:[#allocation2] sm:$0x3] %vm34_vm0, %v136_v1  ;;  %v87_v3 = vld [vmem:[#allocation3] sm:$0x1]  ;;  %v101_v4 = vunpack.c.l.bf16 %v100_v2  ;;  %v102_v5 = vunpack.c.h.bf16 %v100_v2  ;;  %vm58_vm2 = vcmask 1041409   ;;  %vm91_vm3 = vcmask 1024  }
  0x17   :  { %103 = vpush %v87_v3  ;;  %v98_v27 = vld [vmem:[%s182_s1] ss:$0 sm:$0xff] }
  0x18   :  { %v42_v6 = vsel %vm41_vm1, %v101_v4, 0.0  ;;  %v49_v7 = vsel %vm41_vm1, %v102_v5, 0.0  ;;  %v70_v23 = vrot.slane %v101_v4, 7  ;;  %v71_v24 = vrot.slane %v102_v5, 6 }
  0x19   :  { %v43_v8 = vrot.slane %v42_v6, 4  ;;  %v50_v9 = vrot.slane %v49_v7, 4 }
  0x1a   :  { %v72_v25 = vsel %vm58_vm2, %v71_v24, %v70_v23 }
  0x1b   :  { %v44_v10 = vadd.f32 %v43_v8, %v42_v6  ;;  %v51_v11 = vadd.f32 %v50_v9, %v49_v7 }
  0x1d   :  { %v45_v12 = vrot.slane %v44_v10, 2  ;;  %v52_v13 = vrot.slane %v51_v11, 2  ;;  %v40_v18 = vld [vmem:[#allocation2] sm:$0x3] }
  0x1f   :  { %v46_v14 = vadd.f32 %v45_v12, %v44_v10  ;;  %v53_v15 = vadd.f32 %v52_v13, %v51_v11 }
  0x21   :  { %v47_v16 = vrot.slane %v46_v14, 1  ;;  %v54_v17 = vrot.slane %v53_v15, 1 }
  0x23   :  { %v48_v19 = vadd.f32 %v47_v16, %v46_v14  ;;  %v55_v20 = vadd.f32 %v54_v17, %v53_v15 }
  0x25   :  { %v59_v21 = vsel %vm58_vm2, %v55_v20, %v48_v19 }
  0x26   :  { %v61_v22 = vadd.f32 %v59_v21, %v40_v18 }
  0x28   :  { %63 = vst.msk [vmem:[#allocation2] sm:$0x3] %vm34_vm0, %v61_v22 }
  0x2f   :  { %v67_v26 = vld [vmem:[#allocation2] sm:$0x3] }
  0x30   :  { %v74_v28 = vsub.f32 %v67_v26, %v72_v25 }
  0x32   :  { %v82_v29 = vmul.f32 %v98_v27, %v74_v28 }
  0x34   :  { %v83_v30 = vsel %vm34_vm0, %v82_v29, 0.0 }
  0x35   :  { %84 = vadd.xlane.f32.xlu0 %v83_v30 }
  0x48   :  { %s104_s28 = spop %103 }
  0x49   :  { %v89_v32 = vstv %s104_s28 }
  0xc2   :  { %v85_v31 = vpop.xlane.xlu0 %84 }
  0xc3   :  { %v86_v33 = vmul.f32 0.14285715, %v85_v31 }
  0xc5   :  { %v90_v34 = vadd.f32 %v89_v32, %v86_v33 }
  0xc7   :  { %92 = vst.msk [vmem:[%s184_s3] sm:$0x3] %vm91_vm3, %v90_v34 }
  0xc8   :  { %97 = vsyncpa [#allocation5], 1 }

</bundles_post_ra>
